<compile_context>
chip_gen: v7x
topology: tpu7x:2x2x1
jax: 0.10.0
libtpu: 0.0.40
codegen_flags: <defaults>
</compile_context>

<pallas_src>
import functools
import math

import jax
import jax.numpy as jnp
from jax import lax
from jax.experimental import pallas as pl
from jax.experimental.pallas import tpu as pltpu

_LANE = 128
_SUBLANE = 8


def _softnorm_mid_kernel(x_ref, o_ref):
    # x_ref: (1, C, TILE_M) block in VMEM; reduce over axis 1 (the norm dim).
    x = x_ref[...].astype(jnp.float32)
    c = jnp.clip(x, 0.0, 1.0)
    ss = jnp.sum(c * c, axis=1, keepdims=True)
    # rsqrt rides the EUP; zero-norm columns give 0 * inf = nan (PyTorch 0/0).
    o_ref[...] = (c * lax.rsqrt(ss)).astype(o_ref.dtype)


def _softnorm_last_kernel(x_ref, o_ref):
    # x_ref: (TILE_B, C) block in VMEM; reduce over the lane axis.
    x = x_ref[...].astype(jnp.float32)
    c = jnp.clip(x, 0.0, 1.0)
    ss = jnp.sum(c * c, axis=-1, keepdims=True)
    o_ref[...] = (c * lax.rsqrt(ss)).astype(o_ref.dtype)


def _round_up(n, m):
    return ((n + m - 1) // m) * m


def _choose_tile_m(C, M):
    """Largest lane-dense tile whose f32 working set stays ~4 MiB per block.

    Keeps double-buffered I/O + in-kernel f32 temporaries well under the
    scoped-VMEM limit on every generation (incl. v7x's 64 MiB physical VMEM),
    while being wide enough to amortize per-grid-step overhead and emit
    unmasked full-lane stores.
    """
    budget_bytes = 4 * 1024 * 1024
    per_lane_bytes = 4 * max(C, _SUBLANE) * 4  # ~4 f32 copies, sublane-padded C
    tile = (budget_bytes // per_lane_bytes) // _LANE * _LANE
    tile = max(_LANE, min(tile, 4096))
    return min(tile, _round_up(M, _LANE))


@functools.partial(jax.jit, static_argnames=("dim",))
def linear_softnorm(x, dim=None):
    """Pallas implementation of LinearSoftnorm(dim)(x)."""
    if dim is None:
        raise ValueError("dimension needs to be defined!")
    ndim = x.ndim
    if dim < 0:
        dim += ndim
    if not 0 <= dim < ndim:
        raise ValueError(f"dim {dim} out of range for rank-{ndim} input")

    shape = x.shape
    C = shape[dim]
    B = math.prod(shape[:dim]) if dim > 0 else 1
    M = math.prod(shape[dim + 1:]) if dim < ndim - 1 else 1

    if M > 1:
        # (B, C, M) view -- pure reshape, no data movement.
        flat = x.reshape(B, C, M)
        tile_m = _choose_tile_m(C, M)
        grid = (B, pl.cdiv(M, tile_m))
        # Conservative scoped-VMEM request: double-buffered in+out blocks plus
        # the f32 temporaries the body materializes (capped for v7x's 64 MiB).
        io_bytes = 2 * 2 * C * tile_m * x.dtype.itemsize
        tmp_bytes = 4 * max(C, _SUBLANE) * tile_m * 4
        vmem_limit = int(min(48 << 20, max(32 << 20, 2 * (io_bytes + tmp_bytes))))
        out = pl.pallas_call(
            _softnorm_mid_kernel,
            out_shape=jax.ShapeDtypeStruct((B, C, M), x.dtype),
            grid_spec=pltpu.PrefetchScalarGridSpec(
                num_scalar_prefetch=0,
                grid=grid,
                in_specs=[pl.BlockSpec((1, C, tile_m), lambda b, m: (b, 0, m))],
                out_specs=pl.BlockSpec((1, C, tile_m), lambda b, m: (b, 0, m)),
            ),
            compiler_params=pltpu.CompilerParams(
                dimension_semantics=("parallel", "parallel"),
                vmem_limit_bytes=vmem_limit,
            ),
        )(flat)
        return out.reshape(shape)

    # dim is the last axis (M == 1): lane-major handling on a (B, C) view.
    flat = x.reshape(B, C)
    tile_b = min(1024, _round_up(B, _SUBLANE))
    grid = (pl.cdiv(B, tile_b),)
    out = pl.pallas_call(
        _softnorm_last_kernel,
        out_shape=jax.ShapeDtypeStruct((B, C), x.dtype),
        grid_spec=pltpu.PrefetchScalarGridSpec(
            num_scalar_prefetch=0,
            grid=grid,
            in_specs=[pl.BlockSpec((tile_b, C), lambda i: (i, 0))],
            out_specs=pl.BlockSpec((tile_b, C), lambda i: (i, 0)),
        ),
        compiler_params=pltpu.CompilerParams(
            dimension_semantics=("parallel",),
            vmem_limit_bytes=32 << 20,
        ),
    )(flat)
    return out.reshape(shape)


def _reference_linear_softnorm(x, dim):
    # Pure-JAX reference mirroring the PyTorch semantics.
    clamped = jnp.clip(x, 0.0, 1.0)
    norm = jnp.sqrt(jnp.sum(clamped * clamped, axis=dim, keepdims=True))
    return clamped / norm


if __name__ == "__main__":
    key = jax.random.PRNGKey(0)
    # NCHW input, linear_softnorm over channels (dim=1).
    x = jax.random.normal(key, (2, 4, 16, 16), dtype=jnp.float32)

    out = jax.block_until_ready(linear_softnorm(x, dim=1))
    ref = _reference_linear_softnorm(x, 1)
    assert out.shape == x.shape and out.dtype == x.dtype
    assert jnp.allclose(out, ref, atol=1e-6, rtol=1e-5, equal_nan=True)

    # Squares along dim sum to 1 wherever the clamped slice is non-zero.
    clamped = jnp.clip(x, 0.0, 1.0)
    valid = jnp.sum(clamped * clamped, axis=1) > 0
    sq = jnp.sum(out.astype(jnp.float32) ** 2, axis=1)
    assert jnp.allclose(jnp.where(valid, sq, 1.0), 1.0, atol=1e-5)

    # Partial edge block along M (M = 10*15 = 150, not a multiple of 128).
    x2 = jax.random.normal(jax.random.PRNGKey(1), (2, 4, 10, 15), dtype=jnp.float32)
    out2 = jax.block_until_ready(linear_softnorm(x2, dim=1))
    assert jnp.allclose(out2, _reference_linear_softnorm(x2, 1),
                        atol=1e-6, rtol=1e-5, equal_nan=True)

    # Degenerate last-dim case exercises the lane-reduction path.
    x3 = jax.random.normal(jax.random.PRNGKey(2), (2, 3, 8, 32), dtype=jnp.float32)
    out3 = jax.block_until_ready(linear_softnorm(x3, dim=-1))
    assert jnp.allclose(out3, _reference_linear_softnorm(x3, 3),
                        atol=1e-6, rtol=1e-5, equal_nan=True)

    print("KERNEL_OK")
</pallas_src>

<mosaic_0001>
module attributes {stable_mosaic.version = 11 : i64} {
  func.func @_softnorm_mid_kernel(%arg0: i32, %arg1: i32, %arg2: memref<1x4x256xf32, #tpu.memory_space<vmem>>, %arg3: memref<1x4x256xf32, #tpu.memory_space<vmem>>) attributes {dimension_semantics = [#tpu.dimension_semantics<parallel>, #tpu.dimension_semantics<parallel>], iteration_bounds = array<i64: 2, 1>, scalar_prefetch = 0 : i64, scratch_operands = 0 : i64, tpu.core_type = #tpu.core_type<tc>, window_params = [{transform_indices = @transform_0, window_bounds = array<i64: 1, 4, 256>}, {transform_indices = @transform_1, window_bounds = array<i64: 1, 4, 256>}]} {
    %c0 = arith.constant 0 : index
    %c0_0 = arith.constant 0 : index
    %c0_1 = arith.constant 0 : index
    %0 = vector.load %arg2[%c0, %c0_0, %c0_1] : memref<1x4x256xf32, #tpu.memory_space<vmem>>, vector<1x4x256xf32>
    %cst = arith.constant 0.000000e+00 : f32
    %cst_2 = arith.constant 1.000000e+00 : f32
    %1 = vector.broadcast %cst : f32 to vector<1x4x256xf32>
    %2 = arith.maximumf %1, %0 : vector<1x4x256xf32>
    %3 = vector.broadcast %cst_2 : f32 to vector<1x4x256xf32>
    %4 = arith.minimumf %3, %2 : vector<1x4x256xf32>
    %5 = arith.mulf %4, %4 : vector<1x4x256xf32>
    %cst_3 = arith.constant dense<0.000000e+00> : vector<1x256xf32>
    %6 = vector.multi_reduction <add>, %5, %cst_3 [1] : vector<1x4x256xf32> to vector<1x256xf32>
    %7 = vector.shape_cast %6 : vector<1x256xf32> to vector<1x1x256xf32>
    %8 = math.rsqrt %7 : vector<1x1x256xf32>
    %9 = vector.broadcast %8 : vector<1x1x256xf32> to vector<1x4x256xf32>
    %10 = arith.mulf %4, %9 : vector<1x4x256xf32>
    %c0_4 = arith.constant 0 : index
    %c0_5 = arith.constant 0 : index
    %c0_6 = arith.constant 0 : index
    %11 = vector.load %arg3[%c0_4, %c0_5, %c0_6] : memref<1x4x256xf32, #tpu.memory_space<vmem>>, vector<1x4x256xf32>
    tpu.vector_store %arg3[%c0_4, %c0_5, %c0_6], %10 {strides = array<i32>} : memref<1x4x256xf32, #tpu.memory_space<vmem>>, vector<1x4x256xf32>,
    return
  }
  func.func @transform_0(%arg0: i32, %arg1: i32) -> (i32, i32, i32) {
    %c0_i32 = arith.constant 0 : i32
    %c0_i32_0 = arith.constant 0 : i32
    return %arg0, %c0_i32, %arg1 : i32, i32, i32
  }
  func.func @transform_1(%arg0: i32, %arg1: i32) -> (i32, i32, i32) {
    %c0_i32 = arith.constant 0 : i32
    %c0_i32_0 = arith.constant 0 : i32
    return %arg0, %c0_i32, %arg1 : i32, i32, i32
  }
}

</mosaic_0001>

<bundles_post_ra>
// kernel: linear_softnorm.1
= control target key start
LH: loop header
LB: loop body
LE: loop exit
PB: predicated region body
PF: predicated region fallthrough
CT: control target
= control target key end

     0   :  { %s348_s6 = smov 0   ;;  %s350_s7 = smov 0   ;;  %s384_s0 = inlined_call_operand.vmem [shape: f32[2,4,256], index: 0, kind: input, shape index: {}]   ;;  %s385_s1 = inlined_call_operand.vmem [shape: f32[2,4,256], index: 1, kind: output, shape index: {}]  }
   0x1   :  { %s352_s8 = smov 0  }
   0x2 LB: > { %s23_s9 = sadd.s32 1, %s332_s7  ;;  %p277_p0 = scmp.ge.s32.totalorder %s336_s8, 1  ;;  %s336_s8 = sphi %s352_s8, %s11_s8   ;;  %s332_s7 = sphi %s350_s7, %s387_s7   ;;  %s328_s6 = sphi %s348_s6, %s386_s6  }
   0x3   : > { %p25_p1 = scmp.ge.s32.totalorder %s23_s9, 2  ;;  %p108_p2 = scmp.lt.s32.totalorder %s336_s8, 3 }
   0x5   : > { %s389_s9 = smov (%p25_p1, %s23_s9), 0  ;;  %p109_p3 = pnand %p277_p0, %p108_p2 }
   0x6   : > { %p137_p4 = scmp.lt.s32.totalorder (!%p109_p3), %s328_s6, 1  ;;  %vm163_vm0 = vcmask (!%p109_p3), 1043456  }
   0x7   : > { %112 = sbr.rel (%p109_p3) target bundleno = 55 (0x37), region = 24 }
   0xe   : > { %s391_s6 = smov (!%p137_p4, %s328_s6), 1 }
   0xf   : > { %s284_s10 = sshll.u32 %s391_s6, 3 }
  0x10   : > { %s144_s13 = scalar_lea.vmem %s384_s0, %s284_s10  ;;  %s154_s16 = scalar_lea.vmem %s385_s1, %s284_s10 }
  0x11   : > { %v156_v0 = vld [vmem:[%s144_s13] sm:$0xff] }
  0x12   : > { %v157_v1 = vmax.f32 %v156_v0, 0.0 }
  0x14   : > { %v158_v2 = vmin.f32 %v157_v1, 1.0 }
  0x16   : > { %v159_v3 = vmul.f32 %v158_v2, %v158_v2 }
  0x18   : > { %v161_v4 = vcombine.high %v159_v3, %v159_v3  ;;  %v164_v5 = vsel %vm163_vm0, %v159_v3, 0.0 }
  0x19   : > { %v165_v6 = vrot.slane %v164_v5, 4 }
  0x1a   : > { %v171_v7 = vsel %vm163_vm0, %v161_v4, 0.0 }
  0x1b   : > { %v166_v8 = vadd.f32 %v165_v6, %v164_v5  ;;  %v172_v9 = vrot.slane %v171_v7, 4 }
  0x1d   : > { %v167_v10 = vrot.slane %v166_v8, 2  ;;  %v173_v11 = vadd.f32 %v172_v9, %v171_v7 }
  0x1f   : > { %v168_v12 = vadd.f32 %v167_v10, %v166_v8  ;;  %v174_v13 = vrot.slane %v173_v11, 2 }
  0x21   : > { %v169_v14 = vrot.slane %v168_v12, 1  ;;  %v175_v15 = vadd.f32 %v174_v13, %v173_v11 }
  0x23   : > { %v170_v16 = vadd.f32 %v169_v14, %v168_v12  ;;  %v176_v17 = vrot.slane %v175_v15, 1 }
  0x25   : > { %v177_v18 = vadd.f32 %v176_v17, %v175_v15  ;;  %310 = vrsqrt.f32 %v170_v16 }
  0x27   : > { %312 = vrsqrt.f32 %v177_v18 }
  0x2f   : > { %v311_v19 = vpop.eup %310 }
  0x31   : > { %v313_v20 = vpop.eup %312 }
  0x32   : > { %v182_v21 = vcombine.low %v311_v19, %v313_v20 }
  0x34   : > { %v184_v22 = vmul.f32 %v182_v21, %v158_v2 }
  0x36   : > { %185 = vst [vmem:[%s154_s16] sm:$0xff] %v184_v22 }
  0x37 PF: > { %s11_s8 = sadd.s32 1, %s336_s8   ;;  %s386_s6 = smov %s332_s7 }
  0x38   : > { %p8_p5 = scmp.ge.s32.totalorder %s11_s8, 4   ;;  %s387_s7 = smov %s389_s9 }
  0x3a   :  { %10 = sbr.rel (!%p8_p5) target bundleno = 2 (0x2), region = 54 }

</bundles_post_ra>
